<compile_context>
chip_gen: v7x
topology: tpu7x:2x2x1
jax: 0.10.0
libtpu: 0.0.40
codegen_flags: <defaults>
</compile_context>

<pallas_src>
import functools

import jax
import jax.numpy as jnp
from jax.experimental import pallas as pl
from jax.experimental.pallas import tpu as pltpu


def _label_smoothing_kernel(logits_ref, target_ref, out_ref, *,
                            n_rows, confidence, smooth_other, w_total):
    s = pl.program_id(0)              # megacore split axis ("parallel")
    i = pl.program_id(1)              # batch-tile axis ("arbitrary", resident accumulator)
    n_tiles = pl.num_programs(1)

    @pl.when(i == 0)
    def _():
        out_ref[0, 0] = jnp.float32(0.0)

    x = logits_ref[...]               # [TB, C], native dtype (no full-tile f32 copy)
    target = target_ref[...]          # [TB, 1] int32
    tb, n_cls = x.shape

    # Batch-tail mask: there is no wrapper-side padding, so the (possibly clamped)
    # tail block can contain garbage rows -> NaN-safe select below.
    row0 = (s * n_tiles + i) * tb
    row_ids = row0 + jax.lax.broadcasted_iota(jnp.int32, (tb, 1), 0)
    valid = row_ids < n_rows          # [TB, 1] bool

    # logsumexp; upcasts are fused into the reductions via type promotion (x bf16 ok).
    row_max = jnp.max(x, axis=1, keepdims=True).astype(jnp.float32)        # [TB, 1]
    sum_exp = jnp.sum(jnp.exp(x - row_max), axis=1, keepdims=True)         # f32 [TB, 1]
    lse = row_max + jnp.log(sum_exp)                                       # [TB, 1]

    # Single fused weighted-logit reduction: w_c = confidence at target, eps elsewhere.
    class_ids = jax.lax.broadcasted_iota(jnp.int32, (1, n_cls), 1)         # [1, C]
    w = jnp.where(class_ids == target,
                  jnp.float32(confidence), jnp.float32(smooth_other))      # bcast [TB, C]
    wsum = jnp.sum(w * x, axis=1, keepdims=True)                           # f32 [TB, 1]

    loss_rows = jnp.float32(w_total) * lse - wsum                          # [TB, 1]
    out_ref[0, 0] += jnp.sum(jnp.where(valid, loss_rows, 0.0))


def _vmem_capacity_bytes():
    try:
        cap = getattr(pltpu.get_tpu_info(), "vmem_capacity_bytes", None)
        if cap:
            return int(cap)
    except Exception:
        pass
    return 64 << 20          # conservative default (v7x per-TensorCore VMEM)


def _num_tensorcores():
    # v7x has 2 TensorCores per chip; v5e/v6e have 1.
    try:
        kind = (getattr(jax.devices()[0], "device_kind", "") or "").lower()
        if "v7" in kind:
            return 2
    except Exception:
        pass
    return 1


def label_smoothing_loss(logits, target, *, smoothing=0.0, tb=None, num_splits=None):
    """Pallas forward of LabelSmoothingLoss.

    logits: [B, C] float array (any float dtype; bf16 recommended for HBM bandwidth)
    target: [B] int array of class ids
    Returns the scalar smoothed cross-entropy loss (mean over the batch).
    """
    B, C = logits.shape
    confidence = 1.0 - smoothing
    smooth_other = smoothing / (C - 1) if C > 1 else 0.0
    w_total = confidence + (C - 1) * smooth_other

    itemsize = jnp.dtype(logits.dtype).itemsize
    row_mult = max(8, 8 * (4 // max(1, itemsize)))     # 8 f32, 16 bf16, 32 int8/fp8

    if num_splits is None:
        num_splits = _num_tensorcores()
    num_splits = max(1, int(num_splits))

    vmem_cap = _vmem_capacity_bytes()

    # ---- C-aware tile sizing: ~2 MiB of logits per grid step, capped so that the
    # double-buffered ingress + ~3 full-tile f32 intermediates stay inside VMEM.
    per_row_bytes = 2 * C * itemsize + 3 * C * 4 + 8
    tb_cap = max(row_mult, int(vmem_cap * 0.6) // per_row_bytes)
    rows_per_split = pl.cdiv(B, num_splits)
    max_useful = pl.cdiv(rows_per_split, row_mult) * row_mult
    tb_want = int(tb) if tb is not None else max(row_mult, (2 << 20) // max(1, C * itemsize))
    tb_eff = min(tb_want, tb_cap, max_useful)
    tb_eff = max(row_mult, (tb_eff // row_mult) * row_mult)

    tiles_per_split = pl.cdiv(B, num_splits * tb_eff)
    last_block = pl.cdiv(B, tb_eff) - 1     # last block holding any valid row

    target2d = target.reshape(B, 1).astype(jnp.int32)

    kernel = functools.partial(
        _label_smoothing_kernel, n_rows=B, confidence=float(confidence),
        smooth_other=float(smooth_other), w_total=float(w_total))

    # Generation-aware VMEM request: double-buffered ingress + targets + f32
    # intermediates + slack, capped below physical capacity.
    need = (2 * tb_eff * C * itemsize + 2 * tb_eff * 4
            + 3 * tb_eff * C * 4 + (2 << 20))
    vmem_limit = int(min(max(need, 16 << 20), int(vmem_cap * 0.85)))

    def block_map(s, i):
        # Clamp so a fully out-of-bounds tail block (possible when B is not a multiple
        # of num_splits*tb) re-reads the last valid block; its rows are masked anyway.
        return (jnp.minimum(s * tiles_per_split + i, last_block), 0)

    partials = pl.pallas_call(
        kernel,
        grid=(num_splits, tiles_per_split),
        in_specs=[
            pl.BlockSpec((tb_eff, C), block_map),   # logits, native dtype
            pl.BlockSpec((tb_eff, 1), block_map),   # targets [TB, 1] int32
        ],
        out_specs=pl.BlockSpec((1, 1), lambda s, i: (s, 0),
                               memory_space=pltpu.MemorySpace.SMEM),
        out_shape=jax.ShapeDtypeStruct((num_splits, 1), jnp.float32),
        compiler_params=pltpu.CompilerParams(
            dimension_semantics=("parallel", "arbitrary"),
            vmem_limit_bytes=vmem_limit),
    )(logits, target2d)

    # Tiny final combine in plain JAX (num_splits scalars).
    return jnp.sum(partials) / jnp.float32(B)


def _reference(logits, target, *, smoothing=0.0):
    """Pure-JAX reference mirroring the PyTorch LabelSmoothingLoss semantics."""
    logits = logits.astype(jnp.float32)
    B, C = logits.shape
    logp = jax.nn.log_softmax(logits, axis=-1)
    true_dist = jnp.full((B, C), smoothing / (C - 1), dtype=jnp.float32)
    true_dist = true_dist.at[jnp.arange(B), target].set(1.0 - smoothing)
    return jnp.mean(jnp.sum(-true_dist * logp, axis=-1))


if __name__ == "__main__":
    B, C = 24, 16          # small shapes; tb=16 forces multiple grid steps + a masked tail
    smoothing = 0.1

    key = jax.random.PRNGKey(0)
    k_logits, k_tgt = jax.random.split(key)
    logits_f32 = jax.random.normal(k_logits, (B, C), dtype=jnp.float32) * 2.0
    target = jax.random.randint(k_tgt, (B,), 0, C, dtype=jnp.int32)

    # f32 ingress, explicit small tile (exercises tail masking / multi-step grid).
    loss = jax.block_until_ready(
        label_smoothing_loss(logits_f32, target, smoothing=smoothing, tb=16))
    ref = _reference(logits_f32, target, smoothing=smoothing)
    assert jnp.isfinite(loss)
    assert jnp.allclose(loss, ref, rtol=1e-5, atol=1e-5), (loss, ref)

    # bf16 ingress (native-dtype HBM read, f32 math inside the kernel; tb rounds to 16).
    logits_bf16 = logits_f32.astype(jnp.bfloat16)
    loss_bf16 = jax.block_until_ready(
        label_smoothing_loss(logits_bf16, target, smoothing=smoothing, tb=16))
    ref_bf16 = _reference(logits_bf16.astype(jnp.float32), target, smoothing=smoothing)
    assert jnp.allclose(loss_bf16, ref_bf16, rtol=1e-4, atol=1e-4), (loss_bf16, ref_bf16)

    # auto-sized tile path (C-aware tb, default num_splits).
    loss_auto = jax.block_until_ready(
        label_smoothing_loss(logits_f32, target, smoothing=smoothing))
    assert jnp.allclose(loss_auto, ref, rtol=1e-5, atol=1e-5), (loss_auto, ref)

    print("KERNEL_OK")
</pallas_src>

<mosaic_0001>
module attributes {stable_mosaic.version = 11 : i64} {
  func.func @_label_smoothing_kernel(%arg0: i32, %arg1: i32, %arg2: memref<16x16xf32, #tpu.memory_space<vmem>>, %arg3: memref<16x1xi32, #tpu.memory_space<vmem>>, %arg4: memref<1x1xf32, #tpu.memory_space<smem>>) attributes {dimension_semantics = [#tpu.dimension_semantics<parallel>, #tpu.dimension_semantics<arbitrary>], iteration_bounds = array<i64: 1, 2>, scalar_prefetch = 0 : i64, scratch_operands = 0 : i64, tpu.core_type = #tpu.core_type<tc>, window_params = [{transform_indices = @transform_0, window_bounds = array<i64: 16, 16>}, {transform_indices = @transform_1, window_bounds = array<i64: 16, 1>}, {transform_indices = @transform_2, window_bounds = array<i64: 1, 1>}]} {
    %c0_i32 = arith.constant 0 : i32
    %0 = arith.cmpi eq, %arg1, %c0_i32 : i32
    %1 = arith.extui %0 : i1 to i32
    %c0_i32_0 = arith.constant 0 : i32
    %2 = arith.cmpi ne, %1, %c0_i32_0 : i32
    scf.if %2 {
      %cst_15 = arith.constant 0.000000e+00 : f32
      %c0_16 = arith.constant 0 : index
      %c0_17 = arith.constant 0 : index
      %44 = memref.load %arg4[%c0_16, %c0_17] : memref<1x1xf32, #tpu.memory_space<smem>>
      memref.store %cst_15, %arg4[%c0_16, %c0_17] : memref<1x1xf32, #tpu.memory_space<smem>>
    } else {
    }
    %c0 = arith.constant 0 : index
    %c0_1 = arith.constant 0 : index
    %3 = vector.load %arg2[%c0, %c0_1] : memref<16x16xf32, #tpu.memory_space<vmem>>, vector<16x16xf32>
    %c0_2 = arith.constant 0 : index
    %c0_3 = arith.constant 0 : index
    %4 = vector.load %arg3[%c0_2, %c0_3] : memref<16x1xi32, #tpu.memory_space<vmem>>, vector<16x1xi32>
    %c2_i32 = arith.constant 2 : i32
    %5 = arith.muli %arg0, %c2_i32 : i32
    %6 = arith.addi %5, %arg1 : i32
    %c16_i32 = arith.constant 16 : i32
    %7 = arith.muli %6, %c16_i32 : i32
    %8 = tpu.iota {dimensions = array<i32: 0>} : vector<16x1xi32>
    %9 = vector.broadcast %7 : i32 to vector<16x1xi32>
    %10 = arith.addi %9, %8 : vector<16x1xi32>
    %c24_i32 = arith.constant 24 : i32
    %11 = vector.broadcast %c24_i32 : i32 to vector<16x1xi32>
    %12 = arith.cmpi slt, %10, %11 : vector<16x1xi32>
    %cst = arith.constant dense<0xFF800000> : vector<16xf32>
    %13 = vector.multi_reduction <maximumf>, %3, %cst [1] : vector<16x16xf32> to vector<16xf32>
    %14 = vector.shape_cast %13 : vector<16xf32> to vector<16x1xf32>
    %15 = vector.broadcast %14 : vector<16x1xf32> to vector<16x16xf32>
    %16 = arith.subf %3, %15 : vector<16x16xf32>
    %17 = math.exp %16 : vector<16x16xf32>
    %cst_4 = arith.constant dense<0.000000e+00> : vector<16xf32>
    %18 = vector.multi_reduction <add>, %17, %cst_4 [1] : vector<16x16xf32> to vector<16xf32>
    %19 = vector.shape_cast %18 : vector<16xf32> to vector<16x1xf32>
    %20 = math.log %19 : vector<16x1xf32>
    %21 = arith.addf %14, %20 : vector<16x1xf32>
    %22 = tpu.iota {dimensions = array<i32: 1>} : vector<1x16xi32>
    %23 = vector.broadcast %22 : vector<1x16xi32> to vector<16x16xi32>
    %24 = vector.broadcast %4 : vector<16x1xi32> to vector<16x16xi32>
    %25 = arith.cmpi eq, %23, %24 : vector<16x16xi32>
    %cst_5 = arith.constant 0.899999976 : f32
    %cst_6 = arith.constant 0.00666666683 : f32
    %26 = vector.broadcast %cst_5 : f32 to vector<16x16xf32>
    %27 = vector.broadcast %cst_6 : f32 to vector<16x16xf32>
    %28 = arith.select %25, %26, %27 : vector<16x16xi1>, vector<16x16xf32>
    %29 = arith.mulf %28, %3 : vector<16x16xf32>
    %cst_7 = arith.constant dense<0.000000e+00> : vector<16xf32>
    %30 = vector.multi_reduction <add>, %29, %cst_7 [1] : vector<16x16xf32> to vector<16xf32>
    %31 = vector.shape_cast %30 : vector<16xf32> to vector<16x1xf32>
    %cst_8 = arith.constant 1.000000e+00 : f32
    %32 = vector.broadcast %cst_8 : f32 to vector<16x1xf32>
    %33 = arith.mulf %32, %21 : vector<16x1xf32>
    %34 = arith.subf %33, %31 : vector<16x1xf32>
    %c0_9 = arith.constant 0 : index
    %c0_10 = arith.constant 0 : index
    %35 = memref.load %arg4[%c0_9, %c0_10] : memref<1x1xf32, #tpu.memory_space<smem>>
    %cst_11 = arith.constant 0.000000e+00 : f32
    %36 = vector.broadcast %cst_11 : f32 to vector<16x1xf32>
    %37 = arith.select %12, %34, %36 : vector<16x1xi1>, vector<16x1xf32>
    %38 = vector.shape_cast %37 : vector<16x1xf32> to vector<1x16x1xf32>
    %cst_12 = arith.constant dense<0.000000e+00> : vector<1xf32>
    %39 = vector.multi_reduction <add>, %38, %cst_12 [1, 2] : vector<1x16x1xf32> to vector<1xf32>
    %40 = vector.shape_cast %39 : vector<1xf32> to vector<1x1x1xf32>
    %41 = vector.extract %40[0, 0, 0] : f32 from vector<1x1x1xf32>
    %42 = arith.addf %35, %41 : f32
    %c0_13 = arith.constant 0 : index
    %c0_14 = arith.constant 0 : index
    %43 = memref.load %arg4[%c0_13, %c0_14] : memref<1x1xf32, #tpu.memory_space<smem>>
    memref.store %42, %arg4[%c0_13, %c0_14] : memref<1x1xf32, #tpu.memory_space<smem>>
    return
  }
  func.func @transform_0(%arg0: i32, %arg1: i32) -> (i32, i32) {
    %c2_i32 = arith.constant 2 : i32
    %0 = arith.muli %arg0, %c2_i32 : i32
    %1 = arith.addi %0, %arg1 : i32
    %c1_i32 = arith.constant 1 : i32
    %2 = arith.minsi %1, %c1_i32 : i32
    %c0_i32 = arith.constant 0 : i32
    %c0_i32_0 = arith.constant 0 : i32
    return %2, %c0_i32 : i32, i32
  }
  func.func @transform_1(%arg0: i32, %arg1: i32) -> (i32, i32) {
    %c2_i32 = arith.constant 2 : i32
    %0 = arith.muli %arg0, %c2_i32 : i32
    %1 = arith.addi %0, %arg1 : i32
    %c1_i32 = arith.constant 1 : i32
    %2 = arith.minsi %1, %c1_i32 : i32
    %c0_i32 = arith.constant 0 : i32
    %c0_i32_0 = arith.constant 0 : i32
    return %2, %c0_i32 : i32, i32
  }
  func.func @transform_2(%arg0: i32, %arg1: i32) -> (i32, i32) {
    %c0_i32 = arith.constant 0 : i32
    %c0_i32_0 = arith.constant 0 : i32
    return %arg0, %c0_i32 : i32, i32
  }
}

</mosaic_0001>

<bundles_post_ra>
// kernel: tpu_custom_call.1
= control target key start
LH: loop header
LB: loop body
LE: loop exit
PB: predicated region body
PF: predicated region fallthrough
CT: control target
= control target key end

     0   :  { %7 = vsyncpa [#allocation3], 0  ;;  %s546_s9 = smov 0   ;;  %s548_s10 = smov 0   ;;  %s606_s0 = inlined_call_operand.vmem [shape: f32[24,16], index: 0, kind: input, shape index: {}]   ;;  %s607_s1 = inlined_call_operand.vmem [shape: s32[24,1], index: 1, kind: input, shape index: {}]   ;;  %s608_s2 = inlined_call_operand.hbm [shape: f32[1,1], index: 2, kind: output, shape index: {}]  }
   0x1   :  { %s550_s11 = smov 0  }
   0x2 LB: > { %s424_s12 = sadd.s32 4294967295, %s525_s11   ;;  %s22_s13 = sadd.s32 1, %s521_s10  ;;  %s525_s11 = sphi %s550_s11, %s13_s11   ;;  %s521_s10 = sphi %s548_s10, %s610_s10   ;;  %s517_s9 = sphi %s546_s9, %s609_s9  }
   0x3   : > { %p23_p0 = scmp.ge.s32.totalorder %s22_s13, 2  ;;  %p427_p1 = scmp.ge.s32.totalorder %s525_s11, 1 }
   0x4   : > { %p185_p2 = scmp.lt.s32.totalorder %s525_s11, 3 }
   0x5   : > { %s612_s13 = smov (%p23_p0, %s22_s13), 0 }
   0x6   : > { %p186_p3 = pnand %p427_p1, %p185_p2 }
   0x7   : > { %p225_p4 = scmp.lt.s32.totalorder (!%p186_p3), %s517_s9, 1  ;;  %v527_v0 = vmov (!%p186_p3), 0   ;;  %vm288_vm0 = vcmask (!%p186_p3), 130048   ;;  %v280_v8 = vlaneseq (!%p186_p3)  ;;  %v528_v17 = vmov (!%p186_p3), 0.006666667   ;;  %s433_s23 = sshll.u32 (!%p186_p3), %s517_s9, 4 }
   0x8   : > { %189 = sbr.rel (%p186_p3) target bundleno = 563 (0x233), region = 28  ;;  %477 = vset.pattern.permute.xlu1 (!%p186_p3), %v527_v0  ;;  %478 = vset.pattern.permute.xlu0 (!%p186_p3), %v527_v0  ;;  %v283_v31 = vstv (!%p186_p3), %s433_s23  ;;  %vm338_vm5 = vcmask (!%p186_p3), 7168   ;;  %p446_p6 = scmp.eq.s32.totalorder (!%p186_p3), %s517_s9, 0 }
   0x9   : > { %v314_v13 = vand.u32 (!%p186_p3), 127, %v280_v8  ;;  %v281_v30 = vshrl.u32 (!%p186_p3), %v280_v8, 7  ;;  %s529_s24 = smov (!%p186_p3), 0.0   ;;  %p447_p7 = scmp.eq.s32.totalorder (!%p186_p3), %s424_s12, 1 }
   0xa   : > { %s487_s30 = scalar_lea.hbm (!%p186_p3), %s608_s2, 16 }
   0xb   : > { %v282_v33 = vadd.s32 (!%p186_p3), 8, %v281_v30  ;;  %v284_v35 = vadd.s32 (!%p186_p3), %v283_v31, %v281_v30  ;;  %p488_p8 = scmp.ne.s32.totalorder (!%p186_p3), %s608_s2, %s487_s30  ;;  %p493_p11 = scmp.lt.u32.totalorder (!%p186_p3), %s487_s30, %s608_s2 }
   0xd   : > { %v285_v39 = vadd.s32 (!%p186_p3), %v283_v31, %v282_v33  ;;  %vm286_vm3 = vcmp.lt.s32.totalorder (!%p186_p3), %v284_v35, 24  ;;  %p489_p9 = pnand (!%p186_p3), %p488_p8, %p447_p7 }
   0xf   : > { %s226_s14 = scalar_select %p225_p4, %s517_s9, 1  ;;  %vm287_vm4 = vcmp.lt.s32.totalorder %v285_v39, 24 }
  0x10   : > { %441 = sst [smem:[#allocation2]] (%p446_p6), %s529_s24  ;;  %p490_p10 = pneg %p489_p9 }
  0x11   : > { %s428_s15 = sshll.u32 %s226_s14, 1  ;;  %s335_s25 = sld [smem:[#allocation2]] }
  0x12   : > { %p232_p5 = scmp.lt.s32.totalorder %s428_s15, 2  ;;  %p495_p12 = pnand %p493_p11, %p490_p10 }
  0x14   : > { %s614_s15 = smov (!%p232_p5, %s428_s15), 2 }
  0x15   : > { %s429_s16 = sshll.u32 %s614_s15, 3 }
  0x16   : > { %s235_s19 = scalar_lea.vmem %s606_s0, %s429_s16  ;;  %s257_s22 = scalar_lea.vmem %s607_s1, %s429_s16 }
  0x17   : > { %v273_v1 = vld [vmem:[%s235_s19] sm:$0xff]  ;;  %v274_v2 = vld [vmem:[%s235_s19 + $0x8] sm:$0xff] }
  0x18   : > { %v275_v3 = vld [vmem:[%s257_s22] sm:$0xff]  ;;  %v289_v4 = vsel %vm288_vm0, %v273_v1, -inf  ;;  %v276_v5 = vld [vmem:[%s257_s22 + $0x8] sm:$0xff]  ;;  %v292_v6 = vsel %vm288_vm0, %v274_v2, -inf }
  0x19   : > { %316 = vperm.xlu1 %477, %v275_v3   ;;  %290 = vmax.xlane.f32.xlu0 %v289_v4 }
  0x1d   : > { %319 = vperm.xlu1 %477, %v276_v5   ;;  %293 = vmax.xlane.f32.xlu0 %v292_v6 }
  0x98   : > { %v317_v11 = vpop.permute.xlu1 %316 }
  0x99   : > { %vm321_vm1 = vcmp.eq.s32.totalorder %v314_v13, %v317_v11 }
  0x9a   : > { %v323_v18 = vsel %vm321_vm1, 0.9, %v528_v17 }
  0x9b   : > { %v325_v19 = vmul.f32 %v323_v18, %v273_v1 }
  0x9c   : > { %v320_v16 = vpop.permute.xlu1 %319 }
  0x9d   : > { %vm322_vm2 = vcmp.eq.s32.totalorder %v314_v13, %v320_v16  ;;  %v327_v23 = vsel %vm288_vm0, %v325_v19, 0.0 }
  0x9e   : > { %v324_v21 = vsel %vm322_vm2, 0.9, %v528_v17 }
  0x9f   : > { %v326_v24 = vmul.f32 %v324_v21, %v274_v2 }
  0xa1   : > { %v330_v27 = vsel %vm288_vm0, %v326_v24, 0.0 }
  0xa6   : > { %v291_v7 = vpop.xlane.xlu0 %290 }
  0xa7   : > { %v295_v9 = vsub.f32 %v273_v1, %v291_v7 }
  0xa9   : > { %v297_v10 = vmul.f32 1.442695, %v295_v9 }
  0xaa   : > { %v294_v12 = vpop.xlane.xlu0 %293 }
  0xab   : > { %479 = vpow2.f32 %v297_v10  ;;  %v296_v14 = vsub.f32 %v274_v2, %v294_v12 }
  0xad   : > { %v299_v15 = vmul.f32 1.442695, %v296_v14 }
  0xaf   : > { %481 = vpow2.f32 %v299_v15 }
  0xb5   : > { %v480_v20 = vpop.eup %479 }
  0xb6   : > { %v301_v22 = vsel %vm288_vm0, %v480_v20, 0.0 }
  0xb7   : > { %302 = vadd.xlane.f32.xlu0 %v301_v22 }
  0xb9   : > { %v482_v25 = vpop.eup %481 }
  0xba   : > { %v304_v26 = vsel %vm288_vm0, %v482_v25, 0.0 }
  0xbb   : > { %305 = vadd.xlane.f32.xlu1 %v304_v26  ;;  %328 = vadd.xlane.f32.xlu0 %v327_v23 }
  0xbf   : > { %331 = vadd.xlane.f32.xlu0 %v330_v27 }
 0x144   : > { %v303_v28 = vpop.xlane.xlu0 %302 }
 0x145   : > { %483 = vlog2.f32 %v303_v28 }
 0x148   : > { %v306_v29 = vpop.xlane.xlu1 %305  ;;  %v329_v36 = vpop.xlane.xlu0 %328 }
 0x149   : > { %485 = vlog2.f32 %v306_v29 }
 0x14c   : > { %v332_v43 = vpop.xlane.xlu0 %331 }
 0x14f   : > { %v484_v32 = vpop.eup %483 }
 0x150   : > { %v308_v34 = vmul.f32 0.6931472, %v484_v32 }
 0x152   : > { %v311_v37 = vadd.f32 %v308_v34, %v291_v7 }
 0x153   : > { %v486_v38 = vpop.eup %485 }
 0x154   : > { %v310_v40 = vmul.f32 0.6931472, %v486_v38  ;;  %v333_v41 = vsub.f32 %v311_v37, %v329_v36 }
 0x156   : > { %v312_v42 = vadd.f32 %v310_v40, %v294_v12  ;;  %v336_v44 = vsel %vm286_vm3, %v333_v41, 0.0 }
 0x157   : > { %v339_v47 = vsel %vm338_vm5, %v336_v44, 0.0 }
 0x158   : > { %v334_v45 = vsub.f32 %v312_v42, %v332_v43 }
 0x15a   : > { %v337_v46 = vsel %vm287_vm4, %v334_v45, 0.0 }
 0x15b   : > { %v340_v48 = vsel %vm338_vm5, %v337_v46, 0.0 }
 0x15c   : > { %v341_v49 = vadd.f32 %v340_v48, %v339_v47 }
 0x15e   : > { %342 = vadd.xlane.f32.xlu0 %v341_v49 }
 0x1eb   : > { %v343_v50 = vpop.xlane.xlu0 %342 }
 0x1ec   : > { %v344_v51 = vrot.slane %v343_v50, 4 }
 0x1ee   : > { %v345_v52 = vadd.f32 %v344_v51, %v343_v50 }
 0x1f0   : > { %v346_v53 = vrot.slane %v345_v52, 2 }
 0x1f2   : > { %v347_v54 = vadd.f32 %v346_v53, %v345_v52 }
 0x1f4   : > { %v348_v55 = vrot.slane %v347_v54, 1 }
 0x1f6   : > { %v349_v56 = vadd.f32 %v348_v55, %v347_v54 }
 0x1f8   : > { %438 = vpush %v349_v56 }
 0x229   : > { %s439_s26 = spop %438 }
 0x22a   : > { %s351_s27 = sadd.f32 %s439_s26, %s335_s25 }
 0x22c   : > { %353 = sst [smem:[#allocation2]] %s351_s27 }
 0x22d   : > { %498 = shalt.err (!%p495_p12)
}
 0x22e   : > { %s530_s7 = smov [#allocation2]  }
 0x22f   : > { %443 = dma.smem_to_hbm (%p447_p7), %s530_s7, 16, %s608_s2, [#allocation3]  }
 0x230   : > { %512 = dma.done.wait (%p447_p7), [#allocation3], 16  }
 0x231   : > { %514 = vsyncadd (%p447_p7), [#allocation3], 4294967280 }
 0x232   : > { %369 = sfence }
 0x233 PF: > { %s13_s11 = sadd.s32 1, %s525_s11   ;;  %s609_s9 = smov %s521_s10 }
 0x234   : > { %p10_p13 = scmp.ge.s32.totalorder %s13_s11, 4   ;;  %s610_s10 = smov %s612_s13 }
 0x236   :  { %12 = sbr.rel (!%p10_p13) target bundleno = 2 (0x2), region = 65 }
 0x23d   :  { %375 = vsyncpa [#allocation3], 1 }
 0x23e   :  { %377 = vsyncpa [#allocation3 + $0x1], 1 }

</bundles_post_ra>
